<compile_context>
chip_gen: v7x
topology: tpu7x:2x2x1
jax: 0.10.0
libtpu: 0.0.40
codegen_flags: <defaults>
</compile_context>

<pallas_src>
import jax
import jax.numpy as jnp
from jax.experimental import pallas as pl
from jax.experimental.pallas import tpu as pltpu


def _round_up(x, m):
    return ((x + m - 1) // m) * m


# ---------------------------------------------------------------------------
# Kernel: everything in transposed (feature-major) orientation.
# ---------------------------------------------------------------------------
def _twinq_kernel(x_ref,                # (D_pad, TILE_B)  compute dtype
                  w1t_ref, b1_ref,      # (2H, D_pad) cdt , (2H, 1) f32
                  w2t_ref, b2_ref,      # (2H, 2H)   cdt , (2H, 1) f32
                  w3t_ref, b3_ref,      # (8, 2H)    cdt , (2,)    f32 (SMEM)
                  out_ref):             # (1, TILE_B) f32 lane-dense row
    cdt = w2t_ref.dtype

    # Layer 1: (2H, D) @ (D, TILE_B) -> (2H, TILE_B), f32 accumulation.
    h = jnp.dot(w1t_ref[...], x_ref[...], preferred_element_type=jnp.float32)
    h = jnp.maximum(h + b1_ref[...], 0.0)

    # Layer 2: fused twin hidden layer (block-diagonal weight, transposed).
    h = jnp.dot(w2t_ref[...], h.astype(cdt), preferred_element_type=jnp.float32)
    h = jnp.maximum(h + b2_ref[...], 0.0)

    # Layer 3: (8, 2H) @ (2H, TILE_B) -> (8, TILE_B); rows 0/1 are the q heads.
    q = jnp.dot(w3t_ref[...], h.astype(cdt), preferred_element_type=jnp.float32)
    q1 = q[0:1, :] + b3_ref[0]
    q2 = q[1:2, :] + b3_ref[1]
    out_ref[...] = jnp.minimum(q1, q2)                       # (1, TILE_B)


# ---------------------------------------------------------------------------
# One-time weight fusion / packing (hoisted out of the per-call hot path).
# ---------------------------------------------------------------------------
def pack_twinq_params(params, compute_dtype=jnp.bfloat16):
    f32 = jnp.float32
    D = params["w1a"].shape[0]
    H = params["w1a"].shape[1]
    twoH = 2 * H
    D_pad = _round_up(D, 16)            # bf16 sublane tile; zero-padded features

    # Layer 1: fused on the output axis, transposed, feature columns padded.
    w1t = jnp.concatenate([params["w1a"], params["w1b"]], axis=1).T    # (2H, D)
    w1t = jnp.pad(w1t, ((0, 0), (0, D_pad - D)))                       # (2H, D_pad)
    b1 = jnp.concatenate([params["b1a"], params["b1b"]], axis=1).T     # (2H, 1)

    # Layer 2: block-diagonal (transposed blocks), off-diagonal exactly zero.
    zH = jnp.zeros((H, H), f32)
    w2t = jnp.block([[params["w2a"].T, zH], [zH, params["w2b"].T]])    # (2H, 2H)
    b2 = jnp.concatenate([params["b2a"], params["b2b"]], axis=1).T     # (2H, 1)

    # Layer 3: heads stacked as rows, padded to 8 sublane-aligned rows.
    w3t = jnp.zeros((8, twoH), f32)
    w3t = w3t.at[0, :H].set(params["w3a"][:, 0])
    w3t = w3t.at[1, H:].set(params["w3b"][:, 0])
    b3 = jnp.concatenate([params["b3a"][0], params["b3b"][0]])         # (2,)

    return {
        "w1t": w1t.astype(compute_dtype), "b1": b1.astype(f32),
        "w2t": w2t.astype(compute_dtype), "b2": b2.astype(f32),
        "w3t": w3t.astype(compute_dtype), "b3": b3.astype(f32),
        "in_dim": D, "in_dim_pad": D_pad, "hidden": H,
        "compute_dtype": compute_dtype,
    }


# ---------------------------------------------------------------------------
# Forward wrapper.
# ---------------------------------------------------------------------------
def twinq_forward(state, action, packed, *, tile_b=None):
    """state: (B, S) f32, action: (B, A) f32, packed: pack_twinq_params(...)."""
    B, S = state.shape
    _, A = action.shape
    D = S + A
    assert D == packed["in_dim"], (D, packed["in_dim"])
    D_pad = packed["in_dim_pad"]
    twoH = 2 * packed["hidden"]
    cdt = packed["compute_dtype"]
    f32 = jnp.float32

    if tile_b is None:
        b_aligned = _round_up(max(B, 1), 128)
        if b_aligned <= 128:
            tile_b = 128
        else:
            # Large tiles to amortize per-grid-step overhead, but keep >= 2
            # grid steps so v7x megacore can shard the batch across both TCs.
            tile_b = min(4096, max(128, (b_aligned // 2) // 128 * 128))
    B_pad = _round_up(B, tile_b)
    n_tiles = B_pad // tile_b

    # Single packing op: concat + cast + transpose + zero-pad -> (D_pad, B_pad).
    sa_t = jnp.concatenate([state, action], axis=1).astype(cdt).T       # (D, B)
    x = jnp.pad(sa_t, ((0, D_pad - D), (0, B_pad - B)))                 # dense slab

    act_bytes = int(jnp.dtype(cdt).itemsize)
    w_elems = int(packed["w1t"].size + packed["w2t"].size + packed["w3t"].size)
    cost = pl.CostEstimate(
        flops=int(2 * B_pad * (D_pad * twoH + twoH * twoH + twoH * 8)),
        transcendentals=0,
        bytes_accessed=int(B_pad * D_pad * act_bytes + w_elems * act_bytes
                           + (packed["b1"].size + packed["b2"].size
                              + packed["b3"].size) * 4 + B_pad * 4),
    )

    out2d = pl.pallas_call(
        _twinq_kernel,
        out_shape=jax.ShapeDtypeStruct((1, B_pad), f32),
        grid=(n_tiles,),
        in_specs=[
            pl.BlockSpec((D_pad, tile_b), lambda i: (0, i)),     # activations (pipelined)
            pl.BlockSpec((twoH, D_pad), lambda i: (0, 0)),       # W1^T  (resident)
            pl.BlockSpec((twoH, 1), lambda i: (0, 0)),           # b1
            pl.BlockSpec((twoH, twoH), lambda i: (0, 0)),        # W2^T block-diag
            pl.BlockSpec((twoH, 1), lambda i: (0, 0)),           # b2
            pl.BlockSpec((8, twoH), lambda i: (0, 0)),           # W3^T heads
            pl.BlockSpec(memory_space=pltpu.MemorySpace.SMEM),   # b3 scalars
        ],
        out_specs=pl.BlockSpec((1, tile_b), lambda i: (0, i)),   # lane-dense row
        compiler_params=pltpu.CompilerParams(
            dimension_semantics=("parallel",)),
        cost_estimate=cost,
    )(x, packed["w1t"], packed["b1"], packed["w2t"], packed["b2"],
      packed["w3t"], packed["b3"])

    return out2d[0, :B]                                          # (B,)


# ---------------------------------------------------------------------------
# Init / reference (PyTorch-equivalent semantics, weights stored transposed).
# ---------------------------------------------------------------------------
def init_twinq_params(key, state_dim, action_dim, hidden_dim=32):
    D = state_dim + action_dim
    dims = [D, hidden_dim, hidden_dim, 1]

    def linear(k, fan_in, fan_out):
        kw, kb = jax.random.split(k)
        bound = 1.0 / jnp.sqrt(jnp.float32(fan_in))
        w = jax.random.uniform(kw, (fan_in, fan_out), jnp.float32, -bound, bound)
        b = jax.random.uniform(kb, (1, fan_out), jnp.float32, -bound, bound)
        return w, b

    keys = jax.random.split(key, 6)
    params = {}
    params["w1a"], params["b1a"] = linear(keys[0], dims[0], dims[1])
    params["w2a"], params["b2a"] = linear(keys[1], dims[1], dims[2])
    params["w3a"], params["b3a"] = linear(keys[2], dims[2], dims[3])
    params["w1b"], params["b1b"] = linear(keys[3], dims[0], dims[1])
    params["w2b"], params["b2b"] = linear(keys[4], dims[1], dims[2])
    params["w3b"], params["b3b"] = linear(keys[5], dims[2], dims[3])
    return params


def twinq_reference(state, action, params):
    sa = jnp.concatenate([state, action], axis=1)

    def mlp(w1, b1, w2, b2, w3, b3):
        h = jnp.maximum(sa @ w1 + b1, 0.0)
        h = jnp.maximum(h @ w2 + b2, 0.0)
        return (h @ w3 + b3)[:, 0]

    q1 = mlp(params["w1a"], params["b1a"], params["w2a"], params["b2a"],
             params["w3a"], params["b3a"])
    q2 = mlp(params["w1b"], params["b1b"], params["w2b"], params["b2b"],
             params["w3b"], params["b3b"])
    return jnp.minimum(q1, q2)


if __name__ == "__main__":
    key = jax.random.PRNGKey(0)
    k_s, k_a, k_p = jax.random.split(key, 3)

    batch, state_dim, action_dim, hidden_dim = 8, 12, 4, 32
    state = jax.random.normal(k_s, (batch, state_dim), jnp.float32)
    action = jax.random.normal(k_a, (batch, action_dim), jnp.float32)
    params = init_twinq_params(k_p, state_dim, action_dim, hidden_dim)

    ref = twinq_reference(state, action, params)

    # Full-precision path: tight check against the f32 reference.
    packed_f32 = pack_twinq_params(params, compute_dtype=jnp.float32)
    out_f32 = jax.block_until_ready(twinq_forward(state, action, packed_f32))
    assert out_f32.shape == (batch,), out_f32.shape
    assert jnp.allclose(out_f32, ref, atol=1e-4, rtol=1e-4), (out_f32, ref)

    # Optimized default path: bf16 activation/weight stream, f32 accumulation.
    packed_bf16 = pack_twinq_params(params, compute_dtype=jnp.bfloat16)
    out = jax.block_until_ready(twinq_forward(state, action, packed_bf16))
    assert out.shape == (batch,), out.shape
    assert jnp.allclose(out, ref, atol=5e-2, rtol=5e-2), (out, ref)

    print("KERNEL_OK")
</pallas_src>

<mosaic_0001>
module attributes {stable_mosaic.version = 11 : i64} {
  func.func @_twinq_kernel(%arg0: i32, %arg1: memref<16x128xf32, #tpu.memory_space<vmem>>, %arg2: memref<64x16xf32, #tpu.memory_space<vmem>>, %arg3: memref<64x1xf32, #tpu.memory_space<vmem>>, %arg4: memref<64x64xf32, #tpu.memory_space<vmem>>, %arg5: memref<64x1xf32, #tpu.memory_space<vmem>>, %arg6: memref<8x64xf32, #tpu.memory_space<vmem>>, %arg7: memref<2xf32, #tpu.memory_space<smem>>, %arg8: memref<1x128xf32, #tpu.memory_space<vmem>>) attributes {dimension_semantics = [#tpu.dimension_semantics<parallel>], iteration_bounds = array<i64: 1>, scalar_prefetch = 0 : i64, scratch_operands = 0 : i64, tpu.core_type = #tpu.core_type<tc>, window_params = [{transform_indices = @transform_0, window_bounds = array<i64: 16, 128>}, {pipeline_mode = #tpu.pipeline_mode<synchronous>, transform_indices = @transform_1, window_bounds = array<i64: 64, 16>}, {pipeline_mode = #tpu.pipeline_mode<synchronous>, transform_indices = @transform_2, window_bounds = array<i64: 64, 1>}, {pipeline_mode = #tpu.pipeline_mode<synchronous>, transform_indices = @transform_3, window_bounds = array<i64: 64, 64>}, {pipeline_mode = #tpu.pipeline_mode<synchronous>, transform_indices = @transform_4, window_bounds = array<i64: 64, 1>}, {pipeline_mode = #tpu.pipeline_mode<synchronous>, transform_indices = @transform_5, window_bounds = array<i64: 8, 64>}, {transform_indices = @transform_6, window_bounds = array<i64: 2>}, {transform_indices = @transform_7, window_bounds = array<i64: 1, 128>}]} {
    %c0 = arith.constant 0 : index
    %c0_0 = arith.constant 0 : index
    %0 = vector.load %arg2[%c0, %c0_0] : memref<64x16xf32, #tpu.memory_space<vmem>>, vector<64x16xf32>
    %c0_1 = arith.constant 0 : index
    %c0_2 = arith.constant 0 : index
    %1 = vector.load %arg1[%c0_1, %c0_2] : memref<16x128xf32, #tpu.memory_space<vmem>>, vector<16x128xf32>
    %cst = arith.constant dense<0.000000e+00> : vector<64x128xf32>
    %2 = tpu.matmul %0, %1, %cst {dimension_numbers = #tpu.dot_dimension_numbers<[1], [0], [0], [1], [0, 0, 1, 1], [], []>} : vector<64x16xf32>, vector<16x128xf32>, vector<64x128xf32> -> vector<64x128xf32>
    %c0_3 = arith.constant 0 : index
    %c0_4 = arith.constant 0 : index
    %3 = vector.load %arg3[%c0_3, %c0_4] : memref<64x1xf32, #tpu.memory_space<vmem>>, vector<64x1xf32>
    %4 = vector.broadcast %3 : vector<64x1xf32> to vector<64x128xf32>
    %5 = arith.addf %2, %4 : vector<64x128xf32>
    %cst_5 = arith.constant 0.000000e+00 : f32
    %6 = vector.broadcast %cst_5 : f32 to vector<64x128xf32>
    %7 = arith.maximumf %5, %6 : vector<64x128xf32>
    %c0_6 = arith.constant 0 : index
    %c0_7 = arith.constant 0 : index
    %8 = vector.load %arg4[%c0_6, %c0_7] : memref<64x64xf32, #tpu.memory_space<vmem>>, vector<64x64xf32>
    %cst_8 = arith.constant dense<0.000000e+00> : vector<64x128xf32>
    %9 = tpu.matmul %8, %7, %cst_8 {dimension_numbers = #tpu.dot_dimension_numbers<[1], [0], [0], [1], [0, 0, 1, 1], [], []>} : vector<64x64xf32>, vector<64x128xf32>, vector<64x128xf32> -> vector<64x128xf32>
    %c0_9 = arith.constant 0 : index
    %c0_10 = arith.constant 0 : index
    %10 = vector.load %arg5[%c0_9, %c0_10] : memref<64x1xf32, #tpu.memory_space<vmem>>, vector<64x1xf32>
    %11 = vector.broadcast %10 : vector<64x1xf32> to vector<64x128xf32>
    %12 = arith.addf %9, %11 : vector<64x128xf32>
    %cst_11 = arith.constant 0.000000e+00 : f32
    %13 = vector.broadcast %cst_11 : f32 to vector<64x128xf32>
    %14 = arith.maximumf %12, %13 : vector<64x128xf32>
    %c0_12 = arith.constant 0 : index
    %c0_13 = arith.constant 0 : index
    %15 = vector.load %arg6[%c0_12, %c0_13] : memref<8x64xf32, #tpu.memory_space<vmem>>, vector<8x64xf32>
    %cst_14 = arith.constant dense<0.000000e+00> : vector<8x128xf32>
    %16 = tpu.matmul %15, %14, %cst_14 {dimension_numbers = #tpu.dot_dimension_numbers<[1], [0], [0], [1], [0, 0, 1, 1], [], []>} : vector<8x64xf32>, vector<64x128xf32>, vector<8x128xf32> -> vector<8x128xf32>
    %17 = vector.extract_strided_slice %16 {offsets = [0, 0], sizes = [1, 128], strides = [1, 1]} : vector<8x128xf32> to vector<1x128xf32>
    %c0_15 = arith.constant 0 : index
    %18 = memref.load %arg7[%c0_15] : memref<2xf32, #tpu.memory_space<smem>>
    %19 = vector.broadcast %18 : f32 to vector<1x128xf32>
    %20 = arith.addf %17, %19 : vector<1x128xf32>
    %21 = vector.extract_strided_slice %16 {offsets = [1, 0], sizes = [1, 128], strides = [1, 1]} : vector<8x128xf32> to vector<1x128xf32>
    %c1 = arith.constant 1 : index
    %22 = memref.load %arg7[%c1] : memref<2xf32, #tpu.memory_space<smem>>
    %23 = vector.broadcast %22 : f32 to vector<1x128xf32>
    %24 = arith.addf %21, %23 : vector<1x128xf32>
    %25 = arith.minimumf %20, %24 : vector<1x128xf32>
    %c0_16 = arith.constant 0 : index
    %c0_17 = arith.constant 0 : index
    %26 = vector.load %arg8[%c0_16, %c0_17] : memref<1x128xf32, #tpu.memory_space<vmem>>, vector<1x128xf32>
    tpu.vector_store %arg8[%c0_16, %c0_17], %25 {strides = array<i32>} : memref<1x128xf32, #tpu.memory_space<vmem>>, vector<1x128xf32>,
    return
  }
  func.func @transform_0(%arg0: i32) -> (i32, i32) {
    %c0_i32 = arith.constant 0 : i32
    %c0_i32_0 = arith.constant 0 : i32
    return %c0_i32, %arg0 : i32, i32
  }
  func.func @transform_1(%arg0: i32) -> (i32, i32) {
    %c0_i32 = arith.constant 0 : i32
    %c0_i32_0 = arith.constant 0 : i32
    %c0_i32_1 = arith.constant 0 : i32
    return %c0_i32, %c0_i32_0 : i32, i32
  }
  func.func @transform_2(%arg0: i32) -> (i32, i32) {
    %c0_i32 = arith.constant 0 : i32
    %c0_i32_0 = arith.constant 0 : i32
    %c0_i32_1 = arith.constant 0 : i32
    return %c0_i32, %c0_i32_0 : i32, i32
  }
  func.func @transform_3(%arg0: i32) -> (i32, i32) {
    %c0_i32 = arith.constant 0 : i32
    %c0_i32_0 = arith.constant 0 : i32
    %c0_i32_1 = arith.constant 0 : i32
    return %c0_i32, %c0_i32_0 : i32, i32
  }
  func.func @transform_4(%arg0: i32) -> (i32, i32) {
    %c0_i32 = arith.constant 0 : i32
    %c0_i32_0 = arith.constant 0 : i32
    %c0_i32_1 = arith.constant 0 : i32
    return %c0_i32, %c0_i32_0 : i32, i32
  }
  func.func @transform_5(%arg0: i32) -> (i32, i32) {
    %c0_i32 = arith.constant 0 : i32
    %c0_i32_0 = arith.constant 0 : i32
    %c0_i32_1 = arith.constant 0 : i32
    return %c0_i32, %c0_i32_0 : i32, i32
  }
  func.func @transform_6(%arg0: i32) -> i32 {
    %c0_i32 = arith.constant 0 : i32
    %c0_i32_0 = arith.constant 0 : i32
    return %c0_i32 : i32
  }
  func.func @transform_7(%arg0: i32) -> (i32, i32) {
    %c0_i32 = arith.constant 0 : i32
    %c0_i32_0 = arith.constant 0 : i32
    return %c0_i32, %arg0 : i32, i32
  }
}

</mosaic_0001>

<bundles_post_ra>
// kernel: tpu_custom_call.1
= control target key start
LH: loop header
LB: loop body
LE: loop exit
PB: predicated region body
PF: predicated region fallthrough
CT: control target
= control target key end

     0   :  { %12 = vsyncpa [#allocation4], 0  ;;  %s907_s0 = inlined_call_operand.vmem [shape: f32[16,128], index: 0, kind: input, shape index: {}]   ;;  %s908_s1 = inlined_call_operand.vmem [shape: f32[64,16], index: 1, kind: input, shape index: {}]   ;;  %s909_s2 = inlined_call_operand.vmem [shape: f32[64,1], index: 2, kind: input, shape index: {}]   ;;  %s910_s3 = inlined_call_operand.vmem [shape: f32[64,64], index: 3, kind: input, shape index: {}]   ;;  %s911_s4 = inlined_call_operand.vmem [shape: f32[64,1], index: 4, kind: input, shape index: {}]   ;;  %s912_s5 = inlined_call_operand.vmem [shape: f32[8,64], index: 5, kind: input, shape index: {}]   ;;  %s913_s6 = inlined_call_operand.vmem [shape: f32[2], index: 6, kind: input, shape index: {}]   ;;  %s914_s7 = inlined_call_operand.hbm [shape: f32[1,128], index: 7, kind: output, shape index: {}]  }
   0x1   :  { %13 = vsyncpa [#allocation3], 0  ;;  %s32_s26 = sshll.u32 %s913_s6, 4  ;;  %s33_s26 = int_to_ptr.vmem [resolvable:$true] %s32_s26 }
   0x2   :  { %s686_s27 = scalar_lea.vmem %s33_s26, 16  ;;  %p691_p1 = scmp.lt.s32.totalorder %s33_s26, %s33_s26 }
   0x3   :  { %p687_p0 = scmp.ne.s32.totalorder %s33_s26, %s686_s27  ;;  %p692_p2 = scmp.lt.s32.totalorder %s686_s27, %s686_s27 }
   0x5   :  { %p693_p3 = por %p692_p2, %p691_p1 }
   0x7   :  { %p694_p4 = pnand %p693_p3, %p687_p0 }
   0x9   :  { %697 = shalt.err (!%p694_p4)
}
   0xa   :  { %s724_s28 = smov [#allocation2]  }
   0xb   :  { %35 = dma.vmem_to_smem %s33_s26, 16, %s724_s28, [#allocation4]  }
   0xc   :  { %720 = dma.done.wait [#allocation4], 16  }
   0xd   :  { %721 = vsyncadd [#allocation4], 4294967280 }
   0xe   :  { %39 = sfence }
   0xf   :  { %v48_v0 = vld [vmem:[%s907_s0] sm:$0xff]  ;;  %v49_v1 = vld [vmem:[%s907_s0 + $0x8] sm:$0xff]  ;;  %vm98_vm0 = vcmask 130048   ;;  %v725_v4 = vmov 0   ;;  %v52_v6 = vld [vmem:[%s909_s2 + $0x10] sm:$0xff]  ;;  %vm292_vm1 = vcmask 523264  }
  0x10   :  { %v40_v2 = vld [vmem:[%s908_s1] sm:$0xff]  ;;  %v646_v3 = vpack.c.bf16 %v49_v1, %v48_v0  ;;  %684 = vset.pattern.permute.xlu0 %v725_v4  ;;  %685 = vset.pattern.permute.xlu1 %v725_v4  ;;  %v41_v7 = vld [vmem:[%s908_s1 + $0x8] sm:$0xff]  ;;  %v42_v8 = vld [vmem:[%s908_s1 + $0x10] sm:$0xff]  ;;  %vm727_vm2 = vmmov 0   ;;  %s547_s19 = sld [smem:[#allocation2 + $0x1]]  ;;  %s504_s20 = sld [smem:[#allocation2]] }
  0x11   :  { %587 = vmatprep.mubr.msk.f32.mxu0 %vm98_vm0, %v40_v2  ;;  %v50_v5 = vld [vmem:[%s909_s2] sm:$0xff]  ;;  %70 = vperm.xlu1 %685, %v52_v6   ;;  %v51_v9 = vld [vmem:[%s909_s2 + $0x8] sm:$0xff]  ;;  %v53_v10 = vld [vmem:[%s909_s2 + $0x18] sm:$0xff] }
  0x12   :  { %647 = vmatprep.subr.bf16.mxu0 %v646_v3  ;;  %60 = vperm.xlu0 %684, %v50_v5   ;;  %v43_v11 = vld [vmem:[%s908_s1 + $0x18] sm:$0xff]  ;;  %v44_v12 = vld [vmem:[%s908_s1 + $0x20] sm:$0xff]  ;;  %v55_v14 = vld [vmem:[%s909_s2 + $0x28] sm:$0xff] }
  0x13   :  { %649 = vmatpush3.bf16.msra.mxu0 %v646_v3  ;;  %v54_v13 = vld [vmem:[%s909_s2 + $0x20] sm:$0xff]  ;;  %v45_v15 = vld [vmem:[%s908_s1 + $0x28] sm:$0xff]  ;;  %v46_v16 = vld [vmem:[%s908_s1 + $0x30] sm:$0xff] }
  0x14   :  { %v56_v17 = vld [vmem:[%s909_s2 + $0x30] sm:$0xff]  ;;  %v57_v18 = vld [vmem:[%s909_s2 + $0x38] sm:$0xff]  ;;  %v244_v20 = vld [vmem:[%s911_s4] sm:$0xff] }
  0x15   :  { %75 = vperm.xlu1 %685, %v53_v10   ;;  %v47_v19 = vld [vmem:[%s908_s1 + $0x38] sm:$0xff]  ;;  %v245_v21 = vld [vmem:[%s911_s4 + $0x8] sm:$0xff]  ;;  %v246_v22 = vld [vmem:[%s911_s4 + $0x10] sm:$0xff]  ;;  %s729_s1 = smov [#allocation5]  }
  0x16   :  { %588 = vmatmul.mubr.msk.f32.vlgmr.msra.gmra.mrb[0].mxu0 %vm98_vm0, %v41_v7  ;;  %65 = vperm.xlu0 %684, %v51_v9   ;;  %v247_v23 = vld [vmem:[%s911_s4 + $0x18] sm:$0xff]  ;;  %v248_v24 = vld [vmem:[%s911_s4 + $0x20] sm:$0xff]  ;;  %v249_v25 = vld [vmem:[%s911_s4 + $0x28] sm:$0xff]  ;;  %v728_v9 = vmov 0.0   ;;  %s521_s21 = sshll.u32 %s729_s1, 4  ;;  %s522_s21 = int_to_ptr.vmem [resolvable:$true] %s521_s21 }
  0x17   :  { %590 = vmatprep.mubr.msk.f32.mxu0 %vm98_vm0, %v42_v8  ;;  %v250_v26 = vld [vmem:[%s911_s4 + $0x30] sm:$0xff]  ;;  %v251_v27 = vld [vmem:[%s911_s4 + $0x38] sm:$0xff]  ;;  %v236_v28 = vld [vmem:[%s910_s3] sm:$0xff]  ;;  %v726_v8 = vmov 0.0|0.0   ;;  %s698_s22 = scalar_lea.vmem %s522_s21, 16  ;;  %s702_s23 = scalar_lea.vmem %s522_s21, 32 }
  0x18   :  { %615 = vmatprep.mubr.msk.f32.mxu1 %vm292_vm1, %v236_v28  ;;  %v237_v1 = vld [vmem:[%s910_s3 + $0x8] sm:$0xff]  ;;  %v238_v2 = vld [vmem:[%s910_s3 + $0x10] sm:$0xff]  ;;  %v239_v3 = vld [vmem:[%s910_s3 + $0x18] sm:$0xff]  ;;  %666 = vmatprep.subr.bf16.mxu0 %v726_v8  ;;  %p699_p5 = scmp.ne.s32.totalorder %s522_s21, %s698_s22  ;;  %p703_p6 = scmp.lt.s32.totalorder %s522_s21, %s522_s21 }
  0x19   :  { %85 = vperm.xlu1 %685, %v55_v14   ;;  %v240_v4 = vld [vmem:[%s910_s3 + $0x20] sm:$0xff]  ;;  %v241_v5 = vld [vmem:[%s910_s3 + $0x28] sm:$0xff]  ;;  %v242_v6 = vld [vmem:[%s910_s3 + $0x30] sm:$0xff]  ;;  %p704_p7 = scmp.lt.s32.totalorder %s702_s23, %s698_s22 }
  0x1a   :  { %591 = vmatmul.mubr.msk.f32.gmra.mrb[2].mxu0 %vm98_vm0, %v43_v11  ;;  %80 = vperm.xlu0 %684, %v54_v13   ;;  %v243_v7 = vld [vmem:[%s910_s3 + $0x38] sm:$0xff] }
  0x1b   :  { %593 = vmatprep.mubr.msk.f32.mxu0 %vm98_vm0, %v44_v12  ;;  %p705_p8 = por %p704_p7, %p703_p6 }
  0x1d   :  { %95 = vperm.xlu1 %685, %v57_v18   ;;  %p706_p9 = pnand %p705_p8, %p699_p5 }
  0x1e   :  { %594 = vmatmul.mubr.msk.f32.gmra.mrb[4].mxu0 %vm98_vm0, %v45_v15  ;;  %90 = vperm.xlu0 %684, %v56_v17  }
  0x1f   :  { %596 = vmatprep.mubr.msk.f32.mxu0 %vm98_vm0, %v46_v16 }
  0x21   :  { %259 = vperm.xlu1 %685, %v245_v21  }
  0x22   :  { %597 = vmatmul.mubr.msk.f32.gmra.mrb[6].mxu0 %vm98_vm0, %v47_v19  ;;  %254 = vperm.xlu0 %684, %v244_v20  }
  0x23   :  { %643 = vmatprep.mubr.msk.f32.mxu0 %vm727_vm2, %v728_v9 }
  0x25   :  { %269 = vperm.xlu1 %685, %v247_v23  }
  0x26   :  { %264 = vperm.xlu0 %684, %v246_v22  }
  0x29   :  { %279 = vperm.xlu1 %685, %v249_v25  }
  0x2a   :  { %274 = vperm.xlu0 %684, %v248_v24  }
  0x2d   :  { %289 = vperm.xlu1 %685, %v251_v27  }
  0x2e   :  { %284 = vperm.xlu0 %684, %v250_v26  }
  0x90   :  { %v71_v30 = vpop.permute.xlu1 %70 }
  0x91   :  { %v61_v29 = vpop.permute.xlu0 %60 }
  0x94   :  { %v76_v32 = vpop.permute.xlu1 %75 }
  0x95   :  { %v66_v31 = vpop.permute.xlu0 %65 }
  0x98   :  { %v86_v42 = vpop.permute.xlu1 %85 }
  0x99   :  { %v81_v45 = vpop.permute.xlu0 %80 }
  0x9c   :  { %v96_v54 = vpop.permute.xlu1 %95 }
  0x9d   :  { %v91_v57 = vpop.permute.xlu0 %90 }
  0xa0   :  { %v260_v10 = vpop.permute.xlu1 %259 }
  0xa1   :  { %v255_v11 = vpop.permute.xlu0 %254 }
  0xa4   :  { %v270_v12 = vpop.permute.xlu1 %269 }
  0xa5   :  { %v265_v14 = vpop.permute.xlu0 %264 }
  0xa8   :  { %v280_v23 = vpop.permute.xlu1 %279 }
  0xa9   :  { %v275_v26 = vpop.permute.xlu0 %274 }
  0xe9   :  { %v589_v33 = vpop.f32.mrb[0].mxu0 }
  0xea   :  { %v195_v34 = vadd.f32 %v589_v33, %v66_v31  ;;  %v189_v35 = vpop.f32.mrb[1].mxu0 }
  0xeb   :  { %v190_v36 = vadd.f32 %v189_v35, %v61_v29  ;;  %v290_v35 = vpop.permute.xlu1 %289 }
  0xec   :  { %v229_v37 = vmax.f32 %v195_v34, 0.0 }
  0xed   :  { %v228_v38 = vmax.f32 %v190_v36, 0.0  ;;  %v592_v39 = vpop.f32.mrb[2].mxu0 }
  0xee   :  { %v205_v40 = vadd.f32 %v592_v39, %v76_v32  ;;  %v199_v41 = vpop.f32.mrb[3].mxu0 }
  0xef   :  { %v200_v43 = vadd.f32 %v199_v41, %v71_v30  ;;  %v650_v44 = vpack.c.bf16 %v229_v37, %v228_v38  ;;  %v285_v38 = vpop.permute.xlu0 %284 }
  0xf0   :  { %v231_v46 = vmax.f32 %v205_v40, 0.0 }
  0xf1   :  { %v230_v47 = vmax.f32 %v200_v43, 0.0  ;;  %v595_v48 = vpop.f32.mrb[4].mxu0  ;;  %651 = vmatprep.subr.bf16.mxu1 %v650_v44 }
  0xf2   :  { %v215_v49 = vadd.f32 %v595_v48, %v86_v42  ;;  %v209_v50 = vpop.f32.mrb[5].mxu0  ;;  %653 = vmatpush3.bf16.msra.mxu1 %v650_v44 }
  0xf3   :  { %v654_v51 = vpack.c.bf16 %v231_v46, %v230_v47  ;;  %v210_v52 = vadd.f32 %v209_v50, %v81_v45  ;;  %v430_v46 = vld [vmem:[%s912_s5] sm:$0xff]  ;;  %v508_v47 = vstv %s547_s19 }
  0xf4   :  { %v233_v53 = vmax.f32 %v215_v49, 0.0  ;;  %v505_v49 = vstv %s504_s20 }
  0xf5   :  { %v232_v55 = vmax.f32 %v210_v52, 0.0  ;;  %v598_v56 = vpop.f32.mrb[6].mxu0  ;;  %655 = vmatprep.subr.bf16.mxu1 %v654_v51 }
  0xf6   :  { %v225_v58 = vadd.f32 %v598_v56, %v96_v54  ;;  %v219_v59 = vpop.f32.mrb[7].mxu0  ;;  %657 = vmatpush3.bf16.msra.mxu1 %v654_v51 }
  0xf7   :  { %v658_v60 = vpack.c.bf16 %v233_v53, %v232_v55  ;;  %v220_v61 = vadd.f32 %v219_v59, %v91_v57 }
  0xf8   :  { %v235_v62 = vmax.f32 %v225_v58, 0.0 }
  0xf9   :  { %v234_v63 = vmax.f32 %v220_v61, 0.0  ;;  %659 = vmatprep.subr.bf16.mxu1 %v658_v60 }
  0xfa   :  { %661 = vmatpush3.bf16.msra.mxu1 %v658_v60 }
  0xfb   :  { %v662_v0 = vpack.c.bf16 %v235_v62, %v234_v63 }
  0xfd   :  { %663 = vmatprep.subr.bf16.mxu1 %v662_v0 }
  0xfe   :  { %665 = vmatpush3.bf16.msra.mxu1 %v662_v0 }
 0x101   :  { %616 = vmatmul.mubr.msk.f32.vlgmr.msra.gmra.mrb[0].mxu1 %vm292_vm1, %v237_v1 }
 0x102   :  { %618 = vmatprep.mubr.msk.f32.mxu1 %vm292_vm1, %v238_v2 }
 0x105   :  { %619 = vmatmul.mubr.msk.f32.gmra.mrb[2].mxu1 %vm292_vm1, %v239_v3 }
 0x106   :  { %621 = vmatprep.mubr.msk.f32.mxu1 %vm292_vm1, %v240_v4 }
 0x109   :  { %622 = vmatmul.mubr.msk.f32.gmra.mrb[4].mxu1 %vm292_vm1, %v241_v5 }
 0x10a   :  { %624 = vmatprep.mubr.msk.f32.mxu1 %vm292_vm1, %v242_v6 }
 0x10d   :  { %625 = vmatmul.mubr.msk.f32.gmra.mrb[6].mxu1 %vm292_vm1, %v243_v7 }
 0x1d4   :  { %v617_v13 = vpop.f32.mrb[0].mxu1 }
 0x1d5   :  { %v389_v15 = vadd.f32 %v617_v13, %v260_v10  ;;  %v383_v16 = vpop.f32.mrb[1].mxu1 }
 0x1d6   :  { %v384_v17 = vadd.f32 %v383_v16, %v255_v11 }
 0x1d7   :  { %v423_v18 = vmax.f32 %v389_v15, 0.0 }
 0x1d8   :  { %v422_v19 = vmax.f32 %v384_v17, 0.0  ;;  %v620_v20 = vpop.f32.mrb[2].mxu1 }
 0x1d9   :  { %v399_v21 = vadd.f32 %v620_v20, %v270_v12  ;;  %v393_v22 = vpop.f32.mrb[3].mxu1 }
 0x1da   :  { %v667_v24 = vpack.c.bf16 %v423_v18, %v422_v19  ;;  %v394_v25 = vadd.f32 %v393_v22, %v265_v14 }
 0x1db   :  { %v425_v27 = vmax.f32 %v399_v21, 0.0 }
 0x1dc   :  { %v424_v28 = vmax.f32 %v394_v25, 0.0  ;;  %v623_v29 = vpop.f32.mrb[4].mxu1  ;;  %668 = vmatpush3.bf16.msra.mxu0 %v667_v24 }
 0x1dd   :  { %v409_v30 = vadd.f32 %v623_v29, %v280_v23  ;;  %v403_v31 = vpop.f32.mrb[5].mxu1  ;;  %669 = vmatprep.subr.bf16.mxu0 %v726_v8 }
 0x1de   :  { %v670_v32 = vpack.c.bf16 %v425_v27, %v424_v28  ;;  %v404_v33 = vadd.f32 %v403_v31, %v275_v26 }
 0x1df   :  { %v427_v34 = vmax.f32 %v409_v30, 0.0 }
 0x1e0   :  { %v426_v36 = vmax.f32 %v404_v33, 0.0  ;;  %v626_v37 = vpop.f32.mrb[6].mxu1  ;;  %671 = vmatpush3.bf16.msra.mxu0 %v670_v32 }
 0x1e1   :  { %v419_v39 = vadd.f32 %v626_v37, %v290_v35  ;;  %v413_v40 = vpop.f32.mrb[7].mxu1  ;;  %672 = vmatprep.subr.bf16.mxu0 %v726_v8 }
 0x1e2   :  { %v673_v41 = vpack.c.bf16 %v427_v34, %v426_v36  ;;  %v414_v42 = vadd.f32 %v413_v40, %v285_v38 }
 0x1e3   :  { %v429_v43 = vmax.f32 %v419_v39, 0.0 }
 0x1e4   :  { %v428_v44 = vmax.f32 %v414_v42, 0.0  ;;  %674 = vmatpush3.bf16.msra.mxu0 %v673_v41 }
 0x1e5   :  { %675 = vmatprep.subr.bf16.mxu0 %v726_v8 }
 0x1e6   :  { %v676_v45 = vpack.c.bf16 %v429_v43, %v428_v44 }
 0x1e8   :  { %677 = vmatpush3.bf16.msra.mxu0 %v676_v45 }
 0x1eb   :  { %644 = vmatmul.mubr.msk.f32.vlgmr.msra.gmra.mrb[8].mxu0 %vm292_vm1, %v430_v46 }
 0x2be   :  { %v500_v48 = vpop.f32.mrb[8].mxu0 }
 0x2bf   :  { %v509_v50 = vadd.f32 %v508_v47, %v500_v48  ;;  %v645_v51 = vpop.f32.mrb[9].mxu0  ;;  %v506_v52 = vadd.f32 %v505_v49, %v500_v48 }
 0x2c1   :  { %v511_v53 = vrot.slane %v509_v50, 1 }
 0x2c3   :  { %v513_v54 = vmin.f32 %v506_v52, %v511_v53 }
 0x2c5   :  { %514 = vst [vmem:[#allocation5] sm:$0x1] %v513_v54 }
 0x2c6   :  { %709 = shalt.err (!%p706_p9)
}
 0x2c7   :  { %s710_s25 = scalar_lea.hbm %s914_s7, 16 }
 0x2c8   :  { %p711_p10 = scmp.ne.s32.totalorder %s914_s7, %s710_s25  ;;  %p714_p11 = scmp.lt.u32.totalorder %s710_s25, %s914_s7 }
 0x2ca   :  { %p716_p12 = pnand %p714_p11, %p711_p10 }
 0x2cc   :  { %719 = shalt.err (!%p716_p12)
}
 0x2cd   :  { %524 = dma.vmem_to_hbm [thread:$0]  %s522_s21, 16, %s914_s7, [#allocation3]  }
 0x2ce   :  { %722 = dma.done.wait [#allocation3], 16  }
 0x2cf   :  { %723 = vsyncadd [#allocation3], 4294967280 }
 0x2d0   :  { %528 = vsyncpa [#allocation3], 1 }
 0x2d1   :  { %529 = vsyncpa [#allocation4], 1 }

</bundles_post_ra>
